<compile_context>
chip_gen: v7x
topology: tpu7x:2x2x1
jax: 0.10.0
libtpu: 0.0.40
codegen_flags: <defaults>
</compile_context>

<pallas_src>
import functools

import jax
import jax.numpy as jnp
from jax.experimental import pallas as pl
from jax.experimental.pallas import tpu as pltpu


MAX_TILE_B = 1024  # rows per grid step; bf16 x-tile = 1024*62*2 B ~= 124 KB


def _round_up(n, m):
    return (n + m - 1) // m * m


def _ttp_kernel(x_ref, w1_ref, b1_ref, w2_ref, b2_ref, w3_ref, b3_ref, o_ref):
    x = x_ref[...]                                                     # (TB, 62) bf16

    # hidden_1 (+ folded bn1) + relu
    h = jnp.dot(x, w1_ref[...], preferred_element_type=jnp.float32) + b1_ref[...]
    h = jnp.maximum(h, 0.0)                                            # (TB, 64) f32

    # hidden_2 (+ folded bn2) + relu
    h = jnp.dot(h.astype(jnp.bfloat16), w2_ref[...],
                preferred_element_type=jnp.float32) + b2_ref[...]
    h = jnp.maximum(h, 0.0)                                            # (TB, 64) f32

    # output linear
    logits = jnp.dot(h.astype(jnp.bfloat16), w3_ref[...],
                     preferred_element_type=jnp.float32) + b3_ref[...]  # (TB, outputnum)

    # softmax along dim=1 (feature axis), f32 epilogue
    m = jnp.max(logits, axis=1, keepdims=True)
    e = jnp.exp(logits - m)
    denom = jnp.sum(e, axis=1, keepdims=True)
    o_ref[...] = e * pl.reciprocal(denom, approx=False)


@functools.partial(jax.jit, static_argnames=())
def transmission_time_predictor(x, kp):
    """x: (B, 62) float32.  kp: dict of folded kernel params.  Returns (B, outputnum) f32."""
    B, f_in = x.shape
    assert f_in == 62, "wrong shape of input"
    out_n = kp["w3"].shape[1]

    tile_b = min(MAX_TILE_B, _round_up(B, 8))
    b_pad = _round_up(B, tile_b)

    xb = x.astype(jnp.bfloat16)                       # halve x HBM traffic
    if b_pad != B:
        xb = jnp.pad(xb, ((0, b_pad - B), (0, 0)))

    grid = (b_pad // tile_b,)

    def resident(shape):
        # Full-array block, same block every grid step -> stays in VMEM.
        return pl.BlockSpec(shape, lambda i: (0, 0))

    in_specs = [
        pl.BlockSpec((tile_b, 62), lambda i: (i, 0)),   # x tile (pipelined)
        resident(kp["w1"].shape), resident(kp["b1"].shape),
        resident(kp["w2"].shape), resident(kp["b2"].shape),
        resident(kp["w3"].shape), resident(kp["b3"].shape),
    ]
    out_specs = pl.BlockSpec((tile_b, out_n), lambda i: (i, 0))

    weight_bytes = sum(int(kp[k].size) * kp[k].dtype.itemsize
                       for k in ("w1", "b1", "w2", "b2", "w3", "b3"))
    cost = pl.CostEstimate(
        flops=2 * b_pad * (62 * 64 + 64 * 64 + 64 * out_n),
        transcendentals=b_pad * out_n,
        bytes_accessed=b_pad * 62 * 2 + b_pad * out_n * 4 + weight_bytes,
    )

    out = pl.pallas_call(
        _ttp_kernel,
        out_shape=jax.ShapeDtypeStruct((b_pad, out_n), jnp.float32),
        grid=grid,
        in_specs=in_specs,
        out_specs=out_specs,
        compiler_params=pltpu.CompilerParams(dimension_semantics=("parallel",)),
        cost_estimate=cost,
    )(xb, kp["w1"], kp["b1"], kp["w2"], kp["b2"], kp["w3"], kp["b3"])

    return out[:B]


# ----------------------------------------------------------------------------
# Parameter construction (synthetic, deterministic) + BN folding.
# ----------------------------------------------------------------------------
def make_raw_params(key, outputnum=21):
    """Raw module parameters (shapes match the nn.Module __init__)."""
    ks = jax.random.split(key, 16)
    f32 = jnp.float32

    def lin(kw, kb, fan_in, fan_out):
        # PyTorch Linear stores (out, in); keep (in, out) so kernel does x @ W.
        w = jax.random.uniform(kw, (fan_in, fan_out), f32, -1.0, 1.0) / jnp.sqrt(f32(fan_in))
        b = jax.random.uniform(kb, (1, fan_out), f32, -1.0, 1.0) / jnp.sqrt(f32(fan_in))
        return w, b

    def bn(kg, kb, km, kv, n):
        gamma = 1.0 + 0.1 * jax.random.normal(kg, (1, n), f32)
        beta = 0.1 * jax.random.normal(kb, (1, n), f32)
        running_mean = 0.1 * jax.random.normal(km, (1, n), f32)
        running_var = jnp.abs(jax.random.normal(kv, (1, n), f32)) + 0.5
        return gamma, beta, running_mean, running_var

    w1, b1 = lin(ks[0], ks[1], 62, 64)
    w2, b2 = lin(ks[2], ks[3], 64, 64)
    w3, b3 = lin(ks[4], ks[5], 64, outputnum)
    g1, be1, m1, v1 = bn(ks[6], ks[7], ks[8], ks[9], 64)
    g2, be2, m2, v2 = bn(ks[10], ks[11], ks[12], ks[13], 64)

    return dict(w1=w1, b1=b1, g1=g1, be1=be1, m1=m1, v1=v1,
                w2=w2, b2=b2, g2=g2, be2=be2, m2=m2, v2=v2,
                w3=w3, b3=b3)


def fold_params(p, eps=1e-5):
    """Fold eval-mode BatchNorm into the Linear layers; cast weights to bf16."""
    def fold(w, b, gamma, beta, mean, var):
        scale = gamma / jnp.sqrt(var + eps)            # (1, n)
        shift = beta - mean * scale
        w_f = w * scale                                 # scale columns
        b_f = b * scale + shift
        return w_f.astype(jnp.bfloat16), b_f.astype(jnp.float32)

    w1, b1 = fold(p["w1"], p["b1"], p["g1"], p["be1"], p["m1"], p["v1"])
    w2, b2 = fold(p["w2"], p["b2"], p["g2"], p["be2"], p["m2"], p["v2"])
    return dict(w1=w1, b1=b1, w2=w2, b2=b2,
                w3=p["w3"].astype(jnp.bfloat16), b3=p["b3"].astype(jnp.float32))


def _reference(x, p, eps=1e-5):
    """Pure-JAX f32 reference matching the PyTorch module in .eval() mode."""
    def bn(h, gamma, beta, mean, var):
        return (h - mean) / jnp.sqrt(var + eps) * gamma + beta

    h = x @ p["w1"] + p["b1"]
    h = jnp.maximum(bn(h, p["g1"], p["be1"], p["m1"], p["v1"]), 0.0)
    h = h @ p["w2"] + p["b2"]
    h = jnp.maximum(bn(h, p["g2"], p["be2"], p["m2"], p["v2"]), 0.0)
    logits = h @ p["w3"] + p["b3"]
    return jax.nn.softmax(logits, axis=1)


if __name__ == "__main__":
    key = jax.random.PRNGKey(0)
    k_x, k_p = jax.random.split(key)

    B = 8
    outputnum = 21
    x = jax.random.normal(k_x, (B, 62), jnp.float32)

    raw = make_raw_params(k_p, outputnum=outputnum)
    kparams = fold_params(raw)

    out = transmission_time_predictor(x, kparams)
    out = jax.block_until_ready(out)

    ref = _reference(x, raw)

    assert out.shape == (B, outputnum), out.shape
    # bf16 MXU inputs (f32 accumulation) -> loosened tolerance vs f32 reference.
    assert jnp.allclose(out, ref, atol=3e-2), "mismatch vs pure-JAX reference"
    # Normalization itself is exact f32 inside the kernel.
    assert jnp.allclose(jnp.sum(out, axis=1), 1.0, atol=1e-5), "softmax rows must sum to 1"

    print("KERNEL_OK")
</pallas_src>

<mosaic_0001>
module attributes {stable_mosaic.version = 11 : i64} {
  func.func @_ttp_kernel(%arg0: i32, %arg1: memref<8x62xbf16, #tpu.memory_space<vmem>>, %arg2: memref<62x64xbf16, #tpu.memory_space<vmem>>, %arg3: memref<1x64xf32, #tpu.memory_space<vmem>>, %arg4: memref<64x64xbf16, #tpu.memory_space<vmem>>, %arg5: memref<1x64xf32, #tpu.memory_space<vmem>>, %arg6: memref<64x21xbf16, #tpu.memory_space<vmem>>, %arg7: memref<1x21xf32, #tpu.memory_space<vmem>>, %arg8: memref<8x21xf32, #tpu.memory_space<vmem>>) attributes {dimension_semantics = [#tpu.dimension_semantics<parallel>], iteration_bounds = array<i64: 1>, scalar_prefetch = 0 : i64, scratch_operands = 0 : i64, tpu.core_type = #tpu.core_type<tc>, window_params = [{transform_indices = @transform_0, window_bounds = array<i64: 8, 62>}, {pipeline_mode = #tpu.pipeline_mode<synchronous>, transform_indices = @transform_1, window_bounds = array<i64: 62, 64>}, {pipeline_mode = #tpu.pipeline_mode<synchronous>, transform_indices = @transform_2, window_bounds = array<i64: 1, 64>}, {pipeline_mode = #tpu.pipeline_mode<synchronous>, transform_indices = @transform_3, window_bounds = array<i64: 64, 64>}, {pipeline_mode = #tpu.pipeline_mode<synchronous>, transform_indices = @transform_4, window_bounds = array<i64: 1, 64>}, {pipeline_mode = #tpu.pipeline_mode<synchronous>, transform_indices = @transform_5, window_bounds = array<i64: 64, 21>}, {pipeline_mode = #tpu.pipeline_mode<synchronous>, transform_indices = @transform_6, window_bounds = array<i64: 1, 21>}, {transform_indices = @transform_7, window_bounds = array<i64: 8, 21>}]} {
    %c0 = arith.constant 0 : index
    %c0_0 = arith.constant 0 : index
    %0 = vector.load %arg1[%c0, %c0_0] : memref<8x62xbf16, #tpu.memory_space<vmem>>, vector<8x62xbf16>
    %c0_1 = arith.constant 0 : index
    %c0_2 = arith.constant 0 : index
    %1 = vector.load %arg2[%c0_1, %c0_2] : memref<62x64xbf16, #tpu.memory_space<vmem>>, vector<62x64xbf16>
    %cst = arith.constant dense<0.000000e+00> : vector<8x64xf32>
    %2 = tpu.matmul %0, %1, %cst {dimension_numbers = #tpu.dot_dimension_numbers<[1], [0], [0], [1], [0, 0, 1, 1], [], []>} : vector<8x62xbf16>, vector<62x64xbf16>, vector<8x64xf32> -> vector<8x64xf32>
    %c0_3 = arith.constant 0 : index
    %c0_4 = arith.constant 0 : index
    %3 = vector.load %arg3[%c0_3, %c0_4] : memref<1x64xf32, #tpu.memory_space<vmem>>, vector<1x64xf32>
    %4 = vector.broadcast %3 : vector<1x64xf32> to vector<8x64xf32>
    %5 = arith.addf %2, %4 : vector<8x64xf32>
    %cst_5 = arith.constant 0.000000e+00 : f32
    %6 = vector.broadcast %cst_5 : f32 to vector<8x64xf32>
    %7 = arith.maximumf %5, %6 : vector<8x64xf32>
    %8 = arith.truncf %7 : vector<8x64xf32> to vector<8x64xbf16>
    %c0_6 = arith.constant 0 : index
    %c0_7 = arith.constant 0 : index
    %9 = vector.load %arg4[%c0_6, %c0_7] : memref<64x64xbf16, #tpu.memory_space<vmem>>, vector<64x64xbf16>
    %cst_8 = arith.constant dense<0.000000e+00> : vector<8x64xf32>
    %10 = tpu.matmul %8, %9, %cst_8 {dimension_numbers = #tpu.dot_dimension_numbers<[1], [0], [0], [1], [0, 0, 1, 1], [], []>} : vector<8x64xbf16>, vector<64x64xbf16>, vector<8x64xf32> -> vector<8x64xf32>
    %c0_9 = arith.constant 0 : index
    %c0_10 = arith.constant 0 : index
    %11 = vector.load %arg5[%c0_9, %c0_10] : memref<1x64xf32, #tpu.memory_space<vmem>>, vector<1x64xf32>
    %12 = vector.broadcast %11 : vector<1x64xf32> to vector<8x64xf32>
    %13 = arith.addf %10, %12 : vector<8x64xf32>
    %cst_11 = arith.constant 0.000000e+00 : f32
    %14 = vector.broadcast %cst_11 : f32 to vector<8x64xf32>
    %15 = arith.maximumf %13, %14 : vector<8x64xf32>
    %16 = arith.truncf %15 : vector<8x64xf32> to vector<8x64xbf16>
    %c0_12 = arith.constant 0 : index
    %c0_13 = arith.constant 0 : index
    %17 = vector.load %arg6[%c0_12, %c0_13] : memref<64x21xbf16, #tpu.memory_space<vmem>>, vector<64x21xbf16>
    %cst_14 = arith.constant dense<0.000000e+00> : vector<8x21xf32>
    %18 = tpu.matmul %16, %17, %cst_14 {dimension_numbers = #tpu.dot_dimension_numbers<[1], [0], [0], [1], [0, 0, 1, 1], [], []>} : vector<8x64xbf16>, vector<64x21xbf16>, vector<8x21xf32> -> vector<8x21xf32>
    %c0_15 = arith.constant 0 : index
    %c0_16 = arith.constant 0 : index
    %19 = vector.load %arg7[%c0_15, %c0_16] : memref<1x21xf32, #tpu.memory_space<vmem>>, vector<1x21xf32>
    %20 = vector.broadcast %19 : vector<1x21xf32> to vector<8x21xf32>
    %21 = arith.addf %18, %20 : vector<8x21xf32>
    %cst_17 = arith.constant dense<0xFF800000> : vector<8xf32>
    %22 = vector.multi_reduction <maximumf>, %21, %cst_17 [1] : vector<8x21xf32> to vector<8xf32>
    %23 = vector.shape_cast %22 : vector<8xf32> to vector<8x1xf32>
    %24 = vector.broadcast %23 : vector<8x1xf32> to vector<8x21xf32>
    %25 = arith.subf %21, %24 : vector<8x21xf32>
    %26 = math.exp %25 : vector<8x21xf32>
    %cst_18 = arith.constant dense<0.000000e+00> : vector<8xf32>
    %27 = vector.multi_reduction <add>, %26, %cst_18 [1] : vector<8x21xf32> to vector<8xf32>
    %28 = vector.shape_cast %27 : vector<8xf32> to vector<8x1xf32>
    %29 = tpu.reciprocal %28 : vector<8x1xf32> -> vector<8x1xf32>
    %30 = vector.broadcast %29 : vector<8x1xf32> to vector<8x21xf32>
    %31 = arith.mulf %26, %30 : vector<8x21xf32>
    %c0_19 = arith.constant 0 : index
    %c0_20 = arith.constant 0 : index
    %32 = vector.load %arg8[%c0_19, %c0_20] : memref<8x21xf32, #tpu.memory_space<vmem>>, vector<8x21xf32>
    tpu.vector_store %arg8[%c0_19, %c0_20], %31 {strides = array<i32>} : memref<8x21xf32, #tpu.memory_space<vmem>>, vector<8x21xf32>,
    return
  }
  func.func @transform_0(%arg0: i32) -> (i32, i32) {
    %c0_i32 = arith.constant 0 : i32
    %c0_i32_0 = arith.constant 0 : i32
    return %arg0, %c0_i32 : i32, i32
  }
  func.func @transform_1(%arg0: i32) -> (i32, i32) {
    %c0_i32 = arith.constant 0 : i32
    %c0_i32_0 = arith.constant 0 : i32
    %c0_i32_1 = arith.constant 0 : i32
    return %c0_i32, %c0_i32_0 : i32, i32
  }
  func.func @transform_2(%arg0: i32) -> (i32, i32) {
    %c0_i32 = arith.constant 0 : i32
    %c0_i32_0 = arith.constant 0 : i32
    %c0_i32_1 = arith.constant 0 : i32
    return %c0_i32, %c0_i32_0 : i32, i32
  }
  func.func @transform_3(%arg0: i32) -> (i32, i32) {
    %c0_i32 = arith.constant 0 : i32
    %c0_i32_0 = arith.constant 0 : i32
    %c0_i32_1 = arith.constant 0 : i32
    return %c0_i32, %c0_i32_0 : i32, i32
  }
  func.func @transform_4(%arg0: i32) -> (i32, i32) {
    %c0_i32 = arith.constant 0 : i32
    %c0_i32_0 = arith.constant 0 : i32
    %c0_i32_1 = arith.constant 0 : i32
    return %c0_i32, %c0_i32_0 : i32, i32
  }
  func.func @transform_5(%arg0: i32) -> (i32, i32) {
    %c0_i32 = arith.constant 0 : i32
    %c0_i32_0 = arith.constant 0 : i32
    %c0_i32_1 = arith.constant 0 : i32
    return %c0_i32, %c0_i32_0 : i32, i32
  }
  func.func @transform_6(%arg0: i32) -> (i32, i32) {
    %c0_i32 = arith.constant 0 : i32
    %c0_i32_0 = arith.constant 0 : i32
    %c0_i32_1 = arith.constant 0 : i32
    return %c0_i32, %c0_i32_0 : i32, i32
  }
  func.func @transform_7(%arg0: i32) -> (i32, i32) {
    %c0_i32 = arith.constant 0 : i32
    %c0_i32_0 = arith.constant 0 : i32
    return %arg0, %c0_i32 : i32, i32
  }
}

</mosaic_0001>

<bundles_post_ra>
// kernel: transmission_time_predictor.1
= control target key start
LH: loop header
LB: loop body
LE: loop exit
PB: predicated region body
PF: predicated region fallthrough
CT: control target
= control target key end

     0   :  { %12 = vsyncpa [#allocation3], 0  ;;  %s582_s0 = inlined_call_operand.vmem [shape: bf16[8,62], index: 0, kind: input, shape index: {}]   ;;  %s583_s1 = inlined_call_operand.vmem [shape: bf16[62,64], index: 1, kind: input, shape index: {}]   ;;  %s584_s2 = inlined_call_operand.vmem [shape: f32[1,64], index: 2, kind: input, shape index: {}]   ;;  %s585_s3 = inlined_call_operand.vmem [shape: bf16[64,64], index: 3, kind: input, shape index: {}]   ;;  %s586_s4 = inlined_call_operand.vmem [shape: f32[1,64], index: 4, kind: input, shape index: {}]   ;;  %s587_s5 = inlined_call_operand.vmem [shape: bf16[64,21], index: 5, kind: input, shape index: {}]   ;;  %s588_s6 = inlined_call_operand.hbm [shape: f32[1,21], index: 6, kind: input, shape index: {}]   ;;  %s589_s7 = inlined_call_operand.hbm [shape: f32[8,21], index: 7, kind: output, shape index: {}]  }
   0x1   :  { %13 = vsyncpa [#allocation4], 0  ;;  %s461_s24 = smov [#allocation2]   ;;  %s413_s28 = scalar_lea.hbm %s588_s6, 16 }
   0x2   :  { %s32_s25 = sshll.u32 %s461_s24, 4  ;;  %p414_p0 = scmp.ne.s32.totalorder %s588_s6, %s413_s28  ;;  %s33_s25 = int_to_ptr.vmem [resolvable:$true] %s32_s25 }
   0x3   :  { %p417_p1 = scmp.lt.u32.totalorder %s413_s28, %s588_s6 }
   0x5   :  { %p419_p2 = pnand %p417_p1, %p414_p0 }
   0x7   :  { %422 = shalt.err (!%p419_p2)
}
   0x8   :  { %s423_s10 = scalar_lea.vmem %s33_s25, 16  ;;  %s427_s11 = scalar_lea.vmem %s33_s25, 32 }
   0x9   :  { %p424_p3 = scmp.ne.s32.totalorder %s33_s25, %s423_s10  ;;  %p428_p4 = scmp.lt.s32.totalorder %s33_s25, %s33_s25 }
   0xa   :  { %p429_p5 = scmp.lt.s32.totalorder %s427_s11, %s423_s10 }
   0xc   :  { %p430_p6 = por %p429_p5, %p428_p4 }
   0xe   :  { %p431_p7 = pnand %p430_p6, %p424_p3 }
  0x10   :  { %434 = shalt.err (!%p431_p7)
}
  0x11   :  { %35 = dma.hbm_to_vmem [thread:$0]  %s588_s6, 16, %s33_s25, [#allocation3]  }
  0x12   :  { %457 = dma.done.wait [#allocation3], 16  }
  0x13   :  { %458 = vsyncadd [#allocation3], 4294967280  ;;  %v462_v0 = vmov 0.0   ;;  %vm463_vm0 = vmmov 0   ;;  %v397_v1 = vld [vmem:[%s583_s1] sm:$0xff]   ;;  %v398_v2 = vld [vmem:[%s583_s1 + $0x8] sm:$0xff]  }
  0x14   :  { %357 = vmatprep.subr.bf16.mxu0 %v462_v0  ;;  %365 = vmatprep.mubr.msk.bf16.mxu0 %vm463_vm0, %v462_v0  ;;  %v399_v3 = vld [vmem:[%s583_s1 + $0x10] sm:$0xff]   ;;  %v401_v4 = vld [vmem:[%s585_s3] sm:$0xff]   ;;  %v400_v5 = vld [vmem:[%s583_s1 + $0x18] sm:$0x7f]   ;;  %vm83_vm1 = vcmask 1046528   ;;  %vm79_vm2 = vcmask 506880  }
  0x15   :  { %369 = vmatprep.subr.bf16.mxu1 %v462_v0  ;;  %377 = vmatprep.mubr.msk.bf16.mxu1 %vm463_vm0, %v462_v0  ;;  %v402_v6 = vld [vmem:[%s585_s3 + $0x8] sm:$0xff]   ;;  %v85_v7 = vsel %vm83_vm1, %v400_v5, 0  ;;  %v40_v8 = vld [vmem:[%s582_s0] sm:$0xf]  ;;  %v403_v9 = vld [vmem:[%s585_s3 + $0x10] sm:$0xff]   ;;  %vm168_vm3 = vcmask 523264  }
  0x16   :  { %358 = vmatpush3.bf16.msra.mxu0 %v397_v1  ;;  %370 = vmatpush3.bf16.msra.mxu1 %v401_v4  ;;  %v404_v10 = vld [vmem:[%s585_s3 + $0x18] sm:$0xff]   ;;  %v405_v11 = vld [vmem:[%s587_s5] sm:$0xff]   ;;  %v406_v12 = vld [vmem:[%s587_s5 + $0x8] sm:$0xff]   ;;  %vm296_vm4 = vcmask 171008  }
  0x17   :  { %359 = vmatprep.subr.bf16.mxu0 %v462_v0  ;;  %371 = vmatprep.subr.bf16.mxu1 %v462_v0  ;;  %v324_v13 = vld [vmem:[%s584_s2] ss:$0 sm:$0xff]  ;;  %v407_v21 = vld [vmem:[%s587_s5 + $0x10] sm:$0xff]   ;;  %v408_v22 = vld [vmem:[%s587_s5 + $0x18] sm:$0xff]  }
  0x18   :  { %v330_v23 = vld [vmem:[%s586_s4] ss:$0 sm:$0xff]  ;;  %v336_v31 = vld [vmem:[#allocation2] ss:$0 sm:$0xff]  ;;  %s464_s4 = smov [#allocation5]  }
  0x19   :  { %s315_s5 = sshll.u32 %s464_s4, 4  ;;  %s316_s5 = int_to_ptr.vmem [resolvable:$true] %s315_s5 }
  0x1a   :  { %360 = vmatpush3.bf16.msra.mxu0 %v398_v2  ;;  %372 = vmatpush3.bf16.msra.mxu1 %v402_v6  ;;  %s435_s16 = scalar_lea.vmem %s316_s5, 128  ;;  %p440_p9 = scmp.lt.s32.totalorder %s316_s5, %s316_s5 }
  0x1b   :  { %361 = vmatprep.subr.bf16.mxu0 %v462_v0  ;;  %373 = vmatprep.subr.bf16.mxu1 %v462_v0  ;;  %p436_p8 = scmp.ne.s32.totalorder %s316_s5, %s435_s16  ;;  %p441_p10 = scmp.lt.s32.totalorder %s435_s16, %s435_s16 }
  0x1d   :  { %p442_p11 = por %p441_p10, %p440_p9 }
  0x1e   :  { %362 = vmatpush3.bf16.msra.mxu0 %v399_v3  ;;  %374 = vmatpush3.bf16.msra.mxu1 %v403_v9 }
  0x1f   :  { %363 = vmatprep.subr.bf16.mxu0 %v462_v0  ;;  %375 = vmatprep.subr.bf16.mxu1 %v462_v0  ;;  %p443_p12 = pnand %p442_p11, %p436_p8 }
  0x22   :  { %364 = vmatpush3.bf16.msra.mxu0 %v85_v7  ;;  %376 = vmatpush3.bf16.msra.mxu1 %v404_v10 }
  0x23   :  { %381 = vmatprep.subr.bf16.mxu0 %v462_v0 }
  0x25   :  { %366 = vmatmul.mubr.msk.bf16.vlgmr.msra.gmra.mrb[0].mxu0 %vm79_vm2, %v40_v8 }
  0x26   :  { %389 = vmatprep.mubr.msk.bf16.mxu0 %vm463_vm0, %v462_v0  ;;  %382 = vmatpush3.bf16.msra.mxu0 %v405_v11 }
  0x27   :  { %383 = vmatprep.subr.bf16.mxu0 %v462_v0 }
  0x2a   :  { %384 = vmatpush3.bf16.msra.mxu0 %v406_v12 }
  0x2b   :  { %385 = vmatprep.subr.bf16.mxu0 %v462_v0 }
  0x2e   :  { %386 = vmatpush3.bf16.msra.mxu0 %v407_v21 }
  0x2f   :  { %387 = vmatprep.subr.bf16.mxu0 %v462_v0 }
  0x32   :  { %388 = vmatpush3.bf16.msra.mxu0 %v408_v22 }
  0xf8   :  { %v121_v14 = vpop.f32.mrb[0].mxu0 }
  0xf9   :  { %v122_v15 = vadd.f32 %v324_v13, %v121_v14  ;;  %v367_v16 = vpop.f32.mrb[1].mxu0 }
  0xfa   :  { %v124_v17 = vpop.f32.mrb[2].mxu0 }
  0xfb   :  { %v127_v18 = vmax.f32 %v122_v15, 0.0  ;;  %v368_v19 = vpop.f32.mrb[3].mxu0 }
  0xfd   :  { %v128_v20 = vpack.c.bf16 %v127_v18, %v127_v18 }
  0xff   :  { %378 = vmatmul.mubr.msk.bf16.vlgmr.msra.gmra.mrb[0].mxu1 %vm168_vm3, %v128_v20 }
 0x1d2   :  { %v206_v24 = vpop.f32.mrb[0].mxu1 }
 0x1d3   :  { %v207_v25 = vadd.f32 %v330_v23, %v206_v24  ;;  %v379_v26 = vpop.f32.mrb[1].mxu1 }
 0x1d4   :  { %v209_v27 = vpop.f32.mrb[2].mxu1 }
 0x1d5   :  { %v212_v28 = vmax.f32 %v207_v25, 0.0  ;;  %v380_v29 = vpop.f32.mrb[3].mxu1 }
 0x1d7   :  { %v213_v30 = vpack.c.bf16 %v212_v28, %v212_v28 }
 0x1d9   :  { %390 = vmatmul.mubr.msk.bf16.vlgmr.msra.gmra.mrb[4].mxu0 %vm168_vm3, %v213_v30 }
 0x2ac   :  { %v290_v32 = vpop.f32.mrb[4].mxu0 }
 0x2ad   :  { %v291_v33 = vadd.f32 %v336_v31, %v290_v32  ;;  %v391_v34 = vpop.f32.mrb[5].mxu0 }
 0x2ae   :  { %v293_v35 = vpop.f32.mrb[6].mxu0 }
 0x2af   :  { %v392_v36 = vpop.f32.mrb[7].mxu0  ;;  %v297_v37 = vsel %vm296_vm4, %v291_v33, -inf }
 0x2b0   :  { %298 = vmax.xlane.f32.xlu0 %v297_v37 }
 0x33d   :  { %v299_v38 = vpop.xlane.xlu0 %298 }
 0x33e   :  { %v300_v39 = vsub.f32 %v291_v33, %v299_v38 }
 0x340   :  { %v301_v40 = vmul.f32 1.442695, %v300_v39 }
 0x342   :  { %409 = vpow2.f32 %v301_v40 }
 0x34c   :  { %v410_v41 = vpop.eup %409 }
 0x34d   :  { %v303_v42 = vsel %vm296_vm4, %v410_v41, 0.0 }
 0x34e   :  { %304 = vadd.xlane.f32.xlu0 %v303_v42 }
 0x3db   :  { %v305_v43 = vpop.xlane.xlu0 %304 }
 0x3dc   :  { %411 = vrcp.f32 %v305_v43 }
 0x3e6   :  { %v412_v44 = vpop.eup %411 }
 0x3e7   :  { %v307_v45 = vmul.f32 %v412_v44, %v410_v41 }
 0x3e9   :  { %308 = vst.msk [vmem:[#allocation5] sm:$0xff] %vm296_vm4, %v307_v45 }
 0x3ea   :  { %446 = shalt.err (!%p443_p12)
}
 0x3eb   :  { %s447_s18 = scalar_lea.hbm %s589_s7, 128 }
 0x3ec   :  { %p448_p13 = scmp.ne.s32.totalorder %s589_s7, %s447_s18  ;;  %p451_p0 = scmp.lt.u32.totalorder %s447_s18, %s589_s7 }
 0x3ee   :  { %p453_p1 = pnand %p451_p0, %p448_p13 }
 0x3f0   :  { %456 = shalt.err (!%p453_p1)
}
 0x3f1   :  { %318 = dma.vmem_to_hbm [thread:$0]  %s316_s5, 128, %s589_s7, [#allocation4]  }
 0x3f2   :  { %459 = dma.done.wait [#allocation4], 128  }
 0x3f3   :  { %460 = vsyncadd [#allocation4], 4294967168 }
 0x3f4   :  { %322 = vsyncpa [#allocation3], 1 }
 0x3f5   :  { %323 = vsyncpa [#allocation4], 1 }

</bundles_post_ra>
